<compile_context>
chip_gen: v5e
topology: v5e:2x2
jax: 0.10.0
libtpu: 0.0.40
codegen_flags: <defaults>
</compile_context>

<pallas_src>
import functools
import math

import jax
import jax.numpy as jnp
from jax import lax
from jax.experimental import pallas as pl
from jax.experimental.pallas import tpu as pltpu

_EPS = 1e-5                      # PyTorch default eps for GroupNorm / BatchNorm2d
_INV_SQRT2 = 1.0 / math.sqrt(2.0)
_LANES = 128                     # lane width: pad all channel dims to this

_TM = 512                        # rows per M-tile for flattened matmuls
_TS = 512                        # spatial rows per tile for per-sample kernels
_VMEM_LIMIT = 48 * 1024 * 1024   # <= v7x's 64 MiB physical, plenty on v5e/v6e


def _round_up(x, m):
    return ((x + m - 1) // m) * m


def _rows_tile(m, desired=_TM):
    # Largest legal tile: full dim if small, else the desired multiple-of-8 tile.
    return m if m <= desired else desired


def _cparams(sems):
    return pltpu.CompilerParams(dimension_semantics=sems,
                                vmem_limit_bytes=_VMEM_LIMIT)


def _const_spec(shape):
    # Grid-invariant operand (weights / biases / gamma): fetch once, single buffer.
    nd = len(shape)
    return pl.BlockSpec(shape, lambda *_: (0,) * nd, pipeline_mode=pl.Buffered(1))


# --------------------------------------------------------------------------
# Pallas kernels
# --------------------------------------------------------------------------

def _stem_matmul_stats_kernel(p_ref, w_ref, b_ref, o_ref, sum_ref, sq_ref,
                              *, hw_total, ts):
    # Stem 4x4/s4 conv as a patch matmul (bf16 in, f32 accumulate) with a
    # per-sample per-channel sum / sumsq epilogue accumulated over the spatial
    # tile axis ('arbitrary').  Feeds BatchNorm batch stats + stage-0 GroupNorm.
    t = pl.program_id(1)

    @pl.when(t == 0)
    def _():
        sum_ref[...] = jnp.zeros_like(sum_ref)
        sq_ref[...] = jnp.zeros_like(sq_ref)

    y = (jnp.dot(p_ref[...], w_ref[...], preferred_element_type=jnp.float32)
         + b_ref[...])                                       # (ts, Cs) f32
    o_ref[...] = y.astype(o_ref.dtype)

    if hw_total % ts != 0:                                   # mask padded rows
        rows = lax.broadcasted_iota(jnp.int32, y.shape, 0) + t * ts
        y = jnp.where(rows < hw_total, y, 0.0)
    sum_ref[...] += jnp.sum(y, axis=0, keepdims=True)
    sq_ref[...] += jnp.sum(y * y, axis=0, keepdims=True)


def _dwconv7_stats_kernel(xp_ref, w_ref, o_ref, sum_ref, sq_ref):
    # Depthwise 7x7 conv (groups == channels), one sample per grid step.
    # dx (W / sublane axis) outermost so there are only 7 shifted W-slices;
    # the 7 dy offsets are cheap slices along the non-tiled H axis.
    # Epilogue emits per-sample per-channel sum / sumsq for the following
    # GroupNorm (no extra read of the activation).
    _, H, W, C = o_ref.shape
    w = w_ref[...]                                           # (7, 7, C) f32
    x = xp_ref[...].astype(jnp.float32)                      # (1, Hp, Wp, C)
    acc = jnp.zeros(o_ref.shape, jnp.float32)
    for dx in range(7):
        xw = x[:, :, dx:dx + W, :]                           # (1, Hp, W, C)
        wx = w[:, dx, :]                                     # (7, C) hoisted taps
        for dy in range(7):
            acc = acc + xw[:, dy:dy + H, :, :] * wx[dy]
    o_ref[...] = acc.astype(o_ref.dtype)
    sum_ref[...] = jnp.sum(acc, axis=(0, 1, 2))[None, None, :]
    sq_ref[...] = jnp.sum(acc * acc, axis=(0, 1, 2))[None, None, :]


def _down_affine_matmul_kernel(x_ref, s_ref, t_ref, w_ref, b_ref, o_ref):
    # Stage downsample: per-sample GroupNorm (+ folded BatchNorm at stage 0)
    # affine applied to the patchified rows, then 2x2/s2 conv as a bf16 matmul.
    xa = (x_ref[...].astype(jnp.float32) * s_ref[...]
          + t_ref[...]).astype(jnp.bfloat16)                 # (tm, 4C)
    y = jnp.dot(xa, w_ref[...], preferred_element_type=jnp.float32) + b_ref[...]
    o_ref[...] = y.astype(o_ref.dtype)


def _pw1_gn_gelu_kernel(x_ref, s_ref, t_ref, w_ref, b_ref, o_ref):
    # Block GroupNorm affine (per sample) + 1x1 conv + exact GELU, fused.
    xa = (x_ref[...].astype(jnp.float32) * s_ref[...]
          + t_ref[...]).astype(jnp.bfloat16)                 # (ts, C)
    y = jnp.dot(xa, w_ref[...], preferred_element_type=jnp.float32) + b_ref[...]
    y = 0.5 * y * (1.0 + lax.erf(y * _INV_SQRT2))            # nn.GELU (exact erf)
    o_ref[...] = y.astype(o_ref.dtype)


def _pw2_scale_res_kernel(x_ref, w_ref, b_ref, g_ref, r_ref, o_ref):
    # 1x1 conv + bias, LayerScaler gamma, residual add -- fused, f32 epilogue.
    y = jnp.dot(x_ref[...], w_ref[...],
                preferred_element_type=jnp.float32) + b_ref[...]
    y = g_ref[...] * y + r_ref[...].astype(jnp.float32)
    o_ref[...] = y.astype(o_ref.dtype)


def _pw2_res_stats_kernel(x_ref, w_ref, b_ref, g_ref, r_ref,
                          o_ref, sum_ref, sq_ref, *, hw_total, ts):
    # Same as _pw2_scale_res_kernel but per-sample, with a per-channel
    # sum / sumsq epilogue feeding the next stage's GroupNorm (used on the
    # last block of every non-final stage).
    t = pl.program_id(1)

    @pl.when(t == 0)
    def _():
        sum_ref[...] = jnp.zeros_like(sum_ref)
        sq_ref[...] = jnp.zeros_like(sq_ref)

    y = jnp.dot(x_ref[...], w_ref[...],
                preferred_element_type=jnp.float32) + b_ref[...]
    y = g_ref[...] * y + r_ref[...].astype(jnp.float32)      # (ts, C)
    o_ref[...] = y.astype(o_ref.dtype)

    if hw_total % ts != 0:                                   # mask padded rows
        rows = lax.broadcasted_iota(jnp.int32, y.shape, 0) + t * ts
        y = jnp.where(rows < hw_total, y, 0.0)
    sum_ref[...] += jnp.sum(y, axis=0, keepdims=True)
    sq_ref[...] += jnp.sum(y * y, axis=0, keepdims=True)


# --------------------------------------------------------------------------
# Pallas-call wrappers
# --------------------------------------------------------------------------

def stem_matmul_stats(patches, w, b):
    # patches: (N, HW, K) bf16; w: (K, Cs) bf16; b: (Cs,) f32.
    N, HW, K = patches.shape
    Cs = w.shape[1]
    ts = _rows_tile(HW, _TS)
    kernel = functools.partial(_stem_matmul_stats_kernel, hw_total=HW, ts=ts)
    out, s, q = pl.pallas_call(
        kernel,
        out_shape=(jax.ShapeDtypeStruct((N, HW, Cs), jnp.bfloat16),
                   jax.ShapeDtypeStruct((N, 1, Cs), jnp.float32),
                   jax.ShapeDtypeStruct((N, 1, Cs), jnp.float32)),
        grid=(N, pl.cdiv(HW, ts)),
        in_specs=[pl.BlockSpec((None, ts, K), lambda n, t: (n, t, 0)),
                  _const_spec((K, Cs)),
                  _const_spec((1, Cs))],
        out_specs=(pl.BlockSpec((None, ts, Cs), lambda n, t: (n, t, 0)),
                   pl.BlockSpec((None, 1, Cs), lambda n, t: (n, 0, 0)),
                   pl.BlockSpec((None, 1, Cs), lambda n, t: (n, 0, 0))),
        compiler_params=_cparams(("parallel", "arbitrary")),
    )(patches, w, b.reshape(1, Cs))
    return out, s[:, 0, :], q[:, 0, :]


def dwconv7_with_stats(x, w):
    # x: (N, H, W, C) bf16; w: (7, 7, C) f32; padding=3, stride=1, no bias.
    N, H, W, C = x.shape
    xp = jnp.pad(x, ((0, 0), (3, 3), (3, 3), (0, 0)))
    Hp, Wp = H + 6, W + 6
    return pl.pallas_call(
        _dwconv7_stats_kernel,
        out_shape=(jax.ShapeDtypeStruct((N, H, W, C), jnp.bfloat16),
                   jax.ShapeDtypeStruct((N, 1, C), jnp.float32),
                   jax.ShapeDtypeStruct((N, 1, C), jnp.float32)),
        grid=(N,),
        in_specs=[pl.BlockSpec((1, Hp, Wp, C), lambda n: (n, 0, 0, 0)),
                  _const_spec((7, 7, C))],
        out_specs=(pl.BlockSpec((1, H, W, C), lambda n: (n, 0, 0, 0)),
                   pl.BlockSpec((1, 1, C), lambda n: (n, 0, 0)),
                   pl.BlockSpec((1, 1, C), lambda n: (n, 0, 0))),
        compiler_params=_cparams(("parallel",)),
    )(xp, w)


def down_affine_matmul(patches, scale, shift, w, b):
    # patches: (N, Ms, KKC) bf16; scale/shift: (N, 1, KKC) f32 per sample;
    # w: (KKC, Cout) bf16; b: (Cout,) f32.  Output bf16.
    N, Ms, KKC = patches.shape
    Cout = w.shape[1]
    tm = _rows_tile(Ms)
    return pl.pallas_call(
        _down_affine_matmul_kernel,
        out_shape=jax.ShapeDtypeStruct((N, Ms, Cout), jnp.bfloat16),
        grid=(N, pl.cdiv(Ms, tm)),
        in_specs=[pl.BlockSpec((None, tm, KKC), lambda n, t: (n, t, 0)),
                  pl.BlockSpec((None, 1, KKC), lambda n, t: (n, 0, 0)),
                  pl.BlockSpec((None, 1, KKC), lambda n, t: (n, 0, 0)),
                  _const_spec((KKC, Cout)),
                  _const_spec((1, Cout))],
        out_specs=pl.BlockSpec((None, tm, Cout), lambda n, t: (n, t, 0)),
        compiler_params=_cparams(("parallel", "parallel")),
    )(patches, scale, shift, w, b.reshape(1, Cout))


def pw1_gn_gelu(h3d, scale, shift, w, b):
    # h3d: (N, HW, C) bf16; scale/shift: (N, C) f32; w: (C, E) bf16; b: (E,) f32.
    N, HW, C = h3d.shape
    E = w.shape[1]
    ts = _rows_tile(HW, _TS)
    return pl.pallas_call(
        _pw1_gn_gelu_kernel,
        out_shape=jax.ShapeDtypeStruct((N, HW, E), jnp.bfloat16),
        grid=(N, pl.cdiv(HW, ts)),
        in_specs=[pl.BlockSpec((None, ts, C), lambda n, t: (n, t, 0)),
                  pl.BlockSpec((None, 1, C), lambda n, t: (n, 0, 0)),
                  pl.BlockSpec((None, 1, C), lambda n, t: (n, 0, 0)),
                  _const_spec((C, E)),
                  _const_spec((1, E))],
        out_specs=pl.BlockSpec((None, ts, E), lambda n, t: (n, t, 0)),
        compiler_params=_cparams(("parallel", "parallel")),
    )(h3d, scale.reshape(N, 1, C), shift.reshape(N, 1, C), w, b.reshape(1, E))


def pw2_scale_res(x2d, w, b, gamma, res2d):
    # x2d: (M, E) bf16; w: (E, C) bf16; b/gamma: (C,) f32; res2d: (M, C) bf16.
    M, E = x2d.shape
    C = w.shape[1]
    tm = _rows_tile(M)
    return pl.pallas_call(
        _pw2_scale_res_kernel,
        out_shape=jax.ShapeDtypeStruct((M, C), jnp.bfloat16),
        grid=(pl.cdiv(M, tm),),
        in_specs=[pl.BlockSpec((tm, E), lambda i: (i, 0)),
                  _const_spec((E, C)),
                  _const_spec((1, C)),
                  _const_spec((1, C)),
                  pl.BlockSpec((tm, C), lambda i: (i, 0))],
        out_specs=pl.BlockSpec((tm, C), lambda i: (i, 0)),
        compiler_params=_cparams(("parallel",)),
    )(x2d, w, b.reshape(1, C), gamma.reshape(1, C), res2d)


def pw2_res_stats(x3d, w, b, gamma, res3d):
    # Per-sample pw2 with a stats epilogue (last block of a non-final stage).
    N, HW, E = x3d.shape
    C = w.shape[1]
    ts = _rows_tile(HW, _TS)
    kernel = functools.partial(_pw2_res_stats_kernel, hw_total=HW, ts=ts)
    return pl.pallas_call(
        kernel,
        out_shape=(jax.ShapeDtypeStruct((N, HW, C), jnp.bfloat16),
                   jax.ShapeDtypeStruct((N, 1, C), jnp.float32),
                   jax.ShapeDtypeStruct((N, 1, C), jnp.float32)),
        grid=(N, pl.cdiv(HW, ts)),
        in_specs=[pl.BlockSpec((None, ts, E), lambda n, t: (n, t, 0)),
                  _const_spec((E, C)),
                  _const_spec((1, C)),
                  _const_spec((1, C)),
                  pl.BlockSpec((None, ts, C), lambda n, t: (n, t, 0))],
        out_specs=(pl.BlockSpec((None, ts, C), lambda n, t: (n, t, 0)),
                   pl.BlockSpec((None, 1, C), lambda n, t: (n, 0, 0)),
                   pl.BlockSpec((None, 1, C), lambda n, t: (n, 0, 0))),
        compiler_params=_cparams(("parallel", "arbitrary")),
    )(x3d, w, b.reshape(1, C), gamma.reshape(1, C), res3d)


# --------------------------------------------------------------------------
# Glue helpers
# --------------------------------------------------------------------------

def _patchify(x, k):
    # Non-overlapping kxk patches, flattened (kh, kw, c) per row, sample-major.
    N, H, W, C = x.shape
    Ho, Wo = H // k, W // k
    p = (x.reshape(N, Ho, k, Wo, k, C)
          .transpose(0, 1, 3, 2, 4, 5)
          .reshape(N, Ho * Wo, k * k * C))
    return p, Ho, Wo


def _gn_fold(sum_nc, sq_nc, ps, pt, *, hw, c_act, gn_w, gn_b):
    # Per-sample GroupNorm(1) affine for y = ps*x + pt, derived from per-sample
    # per-channel sums of x over the spatial dims.  Padded channel lanes carry
    # zeros in the sums and in ps/pt/gn_w/gn_b, so they contribute nothing;
    # the normalization count uses the ACTUAL channel width.
    sum_y = ps[None] * sum_nc + pt[None] * hw
    sq_y = ((ps * ps)[None] * sq_nc + 2.0 * (ps * pt)[None] * sum_nc
            + (pt * pt)[None] * hw)
    count = hw * c_act
    s = jnp.sum(sum_y, axis=-1)
    q = jnp.sum(sq_y, axis=-1)
    mean = s / count
    var = jnp.maximum(q / count - mean * mean, 0.0)
    rstd = lax.rsqrt(var + _EPS)
    gscale = ps[None] * rstd[:, None] * gn_w[None]
    gshift = (pt[None] - mean[:, None]) * rstd[:, None] * gn_w[None] + gn_b[None]
    return gscale, gshift                                    # each (N, C)


def _pad_axis(a, axis, target):
    pad = target - a.shape[axis]
    if pad == 0:
        return a
    widths = [(0, 0)] * a.ndim
    widths[axis] = (0, pad)
    return jnp.pad(a, widths)


# --------------------------------------------------------------------------
# Parameter construction (deterministic, in-script; channel dims padded)
# --------------------------------------------------------------------------

def init_params(key, in_channels, stem_features, depths, widths):
    keys = iter(jax.random.split(key, 1024))

    def randw(fan_in, shape):
        return jax.random.normal(next(keys), shape, jnp.float32) / math.sqrt(fan_in)

    cs = stem_features
    csp = _round_up(cs, _LANES)
    params = {
        "stem_c": cs,
        "stem_w": _pad_axis(randw(in_channels * 16, (4 * 4 * in_channels, cs)),
                            1, csp).astype(jnp.bfloat16),
        "stem_b": _pad_axis(randw(in_channels * 16, (cs,)), 0, csp),
        # BatchNorm2d default init: weight=1, bias=0 (padded lanes zero)
        "bn_w": _pad_axis(jnp.ones((cs,), jnp.float32), 0, csp),
        "bn_b": jnp.zeros((csp,), jnp.float32),
        "stages": [],
    }

    stage_ins = [cs] + list(widths[:-1])
    for in_f, out_f, depth in zip(stage_ins, widths, depths):
        inp, outp = _round_up(in_f, _LANES), _round_up(out_f, _LANES)
        dw = randw(in_f * 4, (2, 2, in_f, out_f))            # (kh, kw, cin, cout)
        dw = _pad_axis(_pad_axis(dw, 2, inp), 3, outp).reshape(4 * inp, outp)
        stage = {
            "in_c": in_f, "out_c": out_f,
            "gn_w": _pad_axis(jnp.ones((in_f,), jnp.float32), 0, inp),
            "gn_b": jnp.zeros((inp,), jnp.float32),
            "down_w": dw.astype(jnp.bfloat16),
            "down_b": _pad_axis(randw(in_f * 4, (out_f,)), 0, outp),
            "blocks": [],
        }
        e = out_f * 4
        ep = _round_up(e, _LANES)
        for _ in range(depth):
            p1 = _pad_axis(_pad_axis(randw(out_f, (out_f, e)), 0, outp), 1, ep)
            p2 = _pad_axis(_pad_axis(randw(e, (e, out_f)), 0, ep), 1, outp)
            stage["blocks"].append({
                "dw_w": _pad_axis(randw(49, (7, 7, out_f)), 2, outp),  # no bias
                "gn_w": _pad_axis(jnp.ones((out_f,), jnp.float32), 0, outp),
                "gn_b": jnp.zeros((outp,), jnp.float32),
                "pw1_w": p1.astype(jnp.bfloat16),
                "pw1_b": _pad_axis(randw(out_f, (e,)), 0, ep),
                "pw2_w": p2.astype(jnp.bfloat16),
                "pw2_b": _pad_axis(randw(e, (out_f,)), 0, outp),
                "gamma": _pad_axis(jnp.full((out_f,), 1e-6, jnp.float32), 0, outp),
            })
        params["stages"].append(stage)
    return params


# --------------------------------------------------------------------------
# Forward pass (matches ConvNextEncoder.forward)
# --------------------------------------------------------------------------

def convnext_encoder(x_nchw, params):
    x = jnp.transpose(x_nchw.astype(jnp.float32), (0, 2, 3, 1))  # NCHW -> NHWC
    x = x.astype(jnp.bfloat16)
    N = x.shape[0]

    # --- Stem: Conv2d(k=4, s=4) as bf16 patch matmul + stats epilogue ------
    patches, Ho, Wo = _patchify(x, 4)                    # (N, HWo, 16*Cin) bf16
    x, csum, csq = stem_matmul_stats(patches, params["stem_w"], params["stem_b"])
    Csp = params["stem_b"].shape[0]
    x = x.reshape(N, Ho, Wo, Csp)

    # BatchNorm2d (training-mode forward, batch statistics), folded into a
    # per-channel affine consumed by stage 0's GroupNorm/downsample.
    # TODO(synk): running_mean/running_var buffer updates are a training-time
    # side effect that does not affect the returned tensor; not reproduced.
    m = N * Ho * Wo
    bn_mean = jnp.sum(csum, axis=0) / m
    bn_var = jnp.maximum(jnp.sum(csq, axis=0) / m - bn_mean * bn_mean, 0.0)
    pre_scale = params["bn_w"] * lax.rsqrt(bn_var + _EPS)
    pre_shift = params["bn_b"] - bn_mean * pre_scale

    n_stages = len(params["stages"])
    for si, stage in enumerate(params["stages"]):
        N, H, W, Cp = x.shape

        # --- Stage entry: GroupNorm(1) (+ folded BN at stage 0) folded into
        # the 2x2/s2 downsample matmul; stats came from the producer kernel.
        gscale, gshift = _gn_fold(csum, csq, pre_scale, pre_shift,
                                  hw=H * W, c_act=stage["in_c"],
                                  gn_w=stage["gn_w"], gn_b=stage["gn_b"])
        patches, Ho, Wo = _patchify(x, 2)                # (N, HWo, 4*Cp) bf16
        sc = jnp.tile(gscale, (1, 4)).reshape(N, 1, 4 * Cp)
        sh = jnp.tile(gshift, (1, 4)).reshape(N, 1, 4 * Cp)
        Cop = stage["down_b"].shape[0]
        x = down_affine_matmul(patches, sc, sh,
                               stage["down_w"], stage["down_b"])
        x = x.reshape(N, Ho, Wo, Cop)
        H, W, Cp = Ho, Wo, Cop
        c_act = stage["out_c"]
        ones_c = jnp.ones((Cp,), jnp.float32)
        zeros_c = jnp.zeros((Cp,), jnp.float32)

        # --- Bottleneck blocks ---------------------------------------------
        n_blocks = len(stage["blocks"])
        for bi, blk in enumerate(stage["blocks"]):
            res = x
            # depthwise 7x7 (pad 3, no bias) + GroupNorm stats epilogue
            h, hs, hq = dwconv7_with_stats(x, blk["dw_w"])
            bscale, bshift = _gn_fold(hs[:, 0, :], hq[:, 0, :], ones_c, zeros_c,
                                      hw=H * W, c_act=c_act,
                                      gn_w=blk["gn_w"], gn_b=blk["gn_b"])
            # GroupNorm affine + 1x1 conv + GELU (fused), bf16 intermediate
            hf = pw1_gn_gelu(h.reshape(N, H * W, Cp), bscale, bshift,
                             blk["pw1_w"], blk["pw1_b"])
            boundary = (bi == n_blocks - 1) and (si < n_stages - 1)
            if boundary:
                # pw2 + gamma + residual, with next-stage GroupNorm stats fused
                x3, bs, bq = pw2_res_stats(hf, blk["pw2_w"], blk["pw2_b"],
                                           blk["gamma"],
                                           res.reshape(N, H * W, Cp))
                x = x3.reshape(N, H, W, Cp)
                csum, csq = bs[:, 0, :], bq[:, 0, :]
            else:
                out2 = pw2_scale_res(hf.reshape(N * H * W, hf.shape[-1]),
                                     blk["pw2_w"], blk["pw2_b"], blk["gamma"],
                                     res.reshape(N * H * W, Cp))
                x = out2.reshape(N, H, W, Cp)

        if n_blocks == 0 and si < n_stages - 1:          # degenerate depth=0
            xf = x.astype(jnp.float32).reshape(N, H * W, Cp)
            csum = jnp.sum(xf, axis=1)
            csq = jnp.sum(xf * xf, axis=1)

        pre_scale, pre_shift = ones_c, zeros_c           # identity for next stage

    c_final = params["stages"][-1]["out_c"]
    x = x[..., :c_final].astype(jnp.float32)             # drop padded lanes
    return jnp.transpose(x, (0, 3, 1, 2))                # NHWC -> NCHW


# --------------------------------------------------------------------------

if __name__ == "__main__":
    key = jax.random.PRNGKey(0)
    kx, kp = jax.random.split(key)

    # Small config: in_channels=4, stem_features=8, depths=[1, 1], widths=[8, 16]
    x = jax.random.normal(kx, (2, 4, 16, 16), jnp.float32)   # NCHW, like PyTorch
    params = init_params(kp, in_channels=4, stem_features=8,
                         depths=[1, 1], widths=[8, 16])

    out = convnext_encoder(x, params)
    out = jax.block_until_ready(out)
    assert out.shape == (2, 16, 1, 1) and out.dtype == jnp.float32
    print("KERNEL_OK")
</pallas_src>

<mosaic_0001>
module attributes {stable_mosaic.version = 11 : i64} {
  func.func @_stem_matmul_stats_kernel(%arg0: i32, %arg1: i32, %arg2: memref<1x16x64xbf16, #tpu.memory_space<vmem>>, %arg3: memref<64x128xbf16, #tpu.memory_space<vmem>>, %arg4: memref<1x128xf32, #tpu.memory_space<vmem>>, %arg5: memref<1x16x128xbf16, #tpu.memory_space<vmem>>, %arg6: memref<1x1x128xf32, #tpu.memory_space<vmem>>, %arg7: memref<1x1x128xf32, #tpu.memory_space<vmem>>) attributes {dimension_semantics = [#tpu.dimension_semantics<parallel>, #tpu.dimension_semantics<arbitrary>], iteration_bounds = array<i64: 2, 1>, scalar_prefetch = 0 : i64, scratch_operands = 0 : i64, tpu.core_type = #tpu.core_type<tc>, window_params = [{transform_indices = @transform_0, window_bounds = array<i64: 1, 16, 64>}, {pipeline_mode = #tpu.pipeline_mode<synchronous>, transform_indices = @transform_1, window_bounds = array<i64: 64, 128>}, {pipeline_mode = #tpu.pipeline_mode<synchronous>, transform_indices = @transform_2, window_bounds = array<i64: 1, 128>}, {transform_indices = @transform_3, window_bounds = array<i64: 1, 16, 128>}, {transform_indices = @transform_4, window_bounds = array<i64: 1, 1, 128>}, {transform_indices = @transform_5, window_bounds = array<i64: 1, 1, 128>}]} {
    %c0_i32 = arith.constant 0 : i32
    %0 = arith.cmpi eq, %arg1, %c0_i32 : i32
    %1 = arith.extui %0 : i1 to i32
    %c0_i32_0 = arith.constant 0 : i32
    %2 = arith.cmpi ne, %1, %c0_i32_0 : i32
    scf.if %2 {
      %cst_24 = arith.constant 0.000000e+00 : f32
      %31 = vector.broadcast %cst_24 : f32 to vector<1x128xf32>
      %c0_25 = arith.constant 0 : index
      %c0_26 = arith.constant 0 : index
      %c0_27 = arith.constant 0 : index
      %32 = vector.load %arg6[%c0_25, %c0_26, %c0_27] : memref<1x1x128xf32, #tpu.memory_space<vmem>>, vector<1x1x128xf32>
      %33 = vector.shape_cast %32 : vector<1x1x128xf32> to vector<1x128xf32>
      %34 = vector.shape_cast %31 : vector<1x128xf32> to vector<1x1x128xf32>
      tpu.vector_store %arg6[%c0_25, %c0_26, %c0_27], %34 {strides = array<i32>} : memref<1x1x128xf32, #tpu.memory_space<vmem>>, vector<1x1x128xf32>,
      %cst_28 = arith.constant 0.000000e+00 : f32
      %35 = vector.broadcast %cst_28 : f32 to vector<1x128xf32>
      %c0_29 = arith.constant 0 : index
      %c0_30 = arith.constant 0 : index
      %c0_31 = arith.constant 0 : index
      %36 = vector.load %arg7[%c0_29, %c0_30, %c0_31] : memref<1x1x128xf32, #tpu.memory_space<vmem>>, vector<1x1x128xf32>
      %37 = vector.shape_cast %36 : vector<1x1x128xf32> to vector<1x128xf32>
      %38 = vector.shape_cast %35 : vector<1x128xf32> to vector<1x1x128xf32>
      tpu.vector_store %arg7[%c0_29, %c0_30, %c0_31], %38 {strides = array<i32>} : memref<1x1x128xf32, #tpu.memory_space<vmem>>, vector<1x1x128xf32>,
    } else {
    }
    %c0 = arith.constant 0 : index
    %c0_1 = arith.constant 0 : index
    %c0_2 = arith.constant 0 : index
    %3 = vector.load %arg2[%c0, %c0_1, %c0_2] : memref<1x16x64xbf16, #tpu.memory_space<vmem>>, vector<1x16x64xbf16>
    %4 = vector.shape_cast %3 : vector<1x16x64xbf16> to vector<16x64xbf16>
    %c0_3 = arith.constant 0 : index
    %c0_4 = arith.constant 0 : index
    %5 = vector.load %arg3[%c0_3, %c0_4] : memref<64x128xbf16, #tpu.memory_space<vmem>>, vector<64x128xbf16>
    %cst = arith.constant dense<0.000000e+00> : vector<16x128xf32>
    %6 = tpu.matmul %4, %5, %cst {dimension_numbers = #tpu.dot_dimension_numbers<[1], [0], [0], [1], [0, 0, 1, 1], [], []>} : vector<16x64xbf16>, vector<64x128xbf16>, vector<16x128xf32> -> vector<16x128xf32>
    %c0_5 = arith.constant 0 : index
    %c0_6 = arith.constant 0 : index
    %7 = vector.load %arg4[%c0_5, %c0_6] : memref<1x128xf32, #tpu.memory_space<vmem>>, vector<1x128xf32>
    %8 = vector.broadcast %7 : vector<1x128xf32> to vector<16x128xf32>
    %9 = arith.addf %6, %8 : vector<16x128xf32>
    %10 = arith.truncf %9 : vector<16x128xf32> to vector<16x128xbf16>
    %c0_7 = arith.constant 0 : index
    %c0_8 = arith.constant 0 : index
    %c0_9 = arith.constant 0 : index
    %11 = vector.load %arg5[%c0_7, %c0_8, %c0_9] : memref<1x16x128xbf16, #tpu.memory_space<vmem>>, vector<1x16x128xbf16>
    %12 = vector.shape_cast %11 : vector<1x16x128xbf16> to vector<16x128xbf16>
    %13 = vector.shape_cast %10 : vector<16x128xbf16> to vector<1x16x128xbf16>
    tpu.vector_store %arg5[%c0_7, %c0_8, %c0_9], %13 {strides = array<i32>} : memref<1x16x128xbf16, #tpu.memory_space<vmem>>, vector<1x16x128xbf16>,
    %c0_10 = arith.constant 0 : index
    %c0_11 = arith.constant 0 : index
    %c0_12 = arith.constant 0 : index
    %14 = vector.load %arg6[%c0_10, %c0_11, %c0_12] : memref<1x1x128xf32, #tpu.memory_space<vmem>>, vector<1x1x128xf32>
    %15 = vector.shape_cast %14 : vector<1x1x128xf32> to vector<1x128xf32>
    %cst_13 = arith.constant dense<0.000000e+00> : vector<128xf32>
    %16 = vector.multi_reduction <add>, %9, %cst_13 [0] : vector<16x128xf32> to vector<128xf32>
    %17 = vector.shape_cast %16 : vector<128xf32> to vector<1x128xf32>
    %18 = arith.addf %15, %17 : vector<1x128xf32>
    %c0_14 = arith.constant 0 : index
    %c0_15 = arith.constant 0 : index
    %c0_16 = arith.constant 0 : index
    %19 = vector.load %arg6[%c0_14, %c0_15, %c0_16] : memref<1x1x128xf32, #tpu.memory_space<vmem>>, vector<1x1x128xf32>
    %20 = vector.shape_cast %19 : vector<1x1x128xf32> to vector<1x128xf32>
    %21 = vector.shape_cast %18 : vector<1x128xf32> to vector<1x1x128xf32>
    tpu.vector_store %arg6[%c0_14, %c0_15, %c0_16], %21 {strides = array<i32>} : memref<1x1x128xf32, #tpu.memory_space<vmem>>, vector<1x1x128xf32>,
    %c0_17 = arith.constant 0 : index
    %c0_18 = arith.constant 0 : index
    %c0_19 = arith.constant 0 : index
    %22 = vector.load %arg7[%c0_17, %c0_18, %c0_19] : memref<1x1x128xf32, #tpu.memory_space<vmem>>, vector<1x1x128xf32>
    %23 = vector.shape_cast %22 : vector<1x1x128xf32> to vector<1x128xf32>
    %24 = arith.mulf %9, %9 : vector<16x128xf32>
    %cst_20 = arith.constant dense<0.000000e+00> : vector<128xf32>
    %25 = vector.multi_reduction <add>, %24, %cst_20 [0] : vector<16x128xf32> to vector<128xf32>
    %26 = vector.shape_cast %25 : vector<128xf32> to vector<1x128xf32>
    %27 = arith.addf %23, %26 : vector<1x128xf32>
    %c0_21 = arith.constant 0 : index
    %c0_22 = arith.constant 0 : index
    %c0_23 = arith.constant 0 : index
    %28 = vector.load %arg7[%c0_21, %c0_22, %c0_23] : memref<1x1x128xf32, #tpu.memory_space<vmem>>, vector<1x1x128xf32>
    %29 = vector.shape_cast %28 : vector<1x1x128xf32> to vector<1x128xf32>
    %30 = vector.shape_cast %27 : vector<1x128xf32> to vector<1x1x128xf32>
    tpu.vector_store %arg7[%c0_21, %c0_22, %c0_23], %30 {strides = array<i32>} : memref<1x1x128xf32, #tpu.memory_space<vmem>>, vector<1x1x128xf32>,
    return
  }
  func.func @transform_0(%arg0: i32, %arg1: i32) -> (i32, i32, i32) {
    %c0_i32 = arith.constant 0 : i32
    %c0_i32_0 = arith.constant 0 : i32
    return %arg0, %arg1, %c0_i32 : i32, i32, i32
  }
  func.func @transform_1(%arg0: i32, %arg1: i32) -> (i32, i32) {
    %c0_i32 = arith.constant 0 : i32
    %c0_i32_0 = arith.constant 0 : i32
    %c0_i32_1 = arith.constant 0 : i32
    return %c0_i32, %c0_i32_0 : i32, i32
  }
  func.func @transform_2(%arg0: i32, %arg1: i32) -> (i32, i32) {
    %c0_i32 = arith.constant 0 : i32
    %c0_i32_0 = arith.constant 0 : i32
    %c0_i32_1 = arith.constant 0 : i32
    return %c0_i32, %c0_i32_0 : i32, i32
  }
  func.func @transform_3(%arg0: i32, %arg1: i32) -> (i32, i32, i32) {
    %c0_i32 = arith.constant 0 : i32
    %c0_i32_0 = arith.constant 0 : i32
    return %arg0, %arg1, %c0_i32 : i32, i32, i32
  }
  func.func @transform_4(%arg0: i32, %arg1: i32) -> (i32, i32, i32) {
    %c0_i32 = arith.constant 0 : i32
    %c0_i32_0 = arith.constant 0 : i32
    %c0_i32_1 = arith.constant 0 : i32
    return %arg0, %c0_i32, %c0_i32_0 : i32, i32, i32
  }
  func.func @transform_5(%arg0: i32, %arg1: i32) -> (i32, i32, i32) {
    %c0_i32 = arith.constant 0 : i32
    %c0_i32_0 = arith.constant 0 : i32
    %c0_i32_1 = arith.constant 0 : i32
    return %arg0, %c0_i32, %c0_i32_0 : i32, i32, i32
  }
}

</mosaic_0001>

<bundles_post_ra>
// kernel: tpu_custom_call.1
= control target key start
LH: loop header
LB: loop body
LE: loop exit
PB: predicated region body
PF: predicated region fallthrough
CT: control target
= control target key end

     0   :  { %s1191_s0 = inlined_call_operand.hbm [shape: bf16[2,16,64], index: 0, kind: input, shape index: {}]   ;;  %s1192_s1 = inlined_call_operand.hbm [shape: bf16[64,128], index: 1, kind: input, shape index: {}]   ;;  %s1193_s2 = inlined_call_operand.vmem [shape: f32[1,128], index: 2, kind: input, shape index: {}]   ;;  %s1194_s3 = inlined_call_operand.hbm [shape: bf16[2,16,128], index: 3, kind: output, shape index: {0}]   ;;  %s1195_s4 = inlined_call_operand.hbm [shape: f32[2,1,128], index: 4, kind: output, shape index: {1}]   ;;  %s1196_s5 = inlined_call_operand.hbm [shape: f32[2,1,128], index: 5, kind: output, shape index: {2}]  }
   0x1   :  { %1203 = sst [smem:[#allocation17_spill]] %s1192_s1 }
   0x2   :  { %11 = vsyncpa [#allocation3], 0 }
   0x3   :  { %13 = vsyncpa [#allocation3 + $0x1], 0 }
   0x4   :  { %14 = vsyncpa [#allocation6], 0 }
   0x5   :  { %15 = vsyncpa [#allocation4], 0 }
   0x6   :  { %17 = vsyncpa [#allocation4 + $0x1], 0 }
   0x7   :  { %18 = vsyncpa [#allocation9], 0 }
   0x8   :  { %20 = vsyncpa [#allocation9 + $0x1], 0  ;;  %s977_s18 = smov 0   ;;  %s979_s19 = smov 0  }
   0x9   :  { %s981_s20 = smov 0   ;;  %s983_s21 = smov 0  }
   0xa   :  { %s985_s22 = smov 0   ;;  %s987_s23 = smov 0  }
   0xb LB: > { %1204 = sst [smem:[#allocation15_spill]] %s939_s23  ;;  %s1008_s24 = sadd.s32 4294967295, %s939_s23   ;;  %s939_s23 = sphi %s987_s23, %s26_s23   ;;  %s935_s22 = sphi %s985_s22, %s1221_s22   ;;  %s931_s21 = sphi %s983_s21, %s1220_s21   ;;  %s927_s20 = sphi %s981_s20, %s1219_s20   ;;  %s923_s19 = sphi %s979_s19, %s1218_s19   ;;  %s919_s18 = sphi %s977_s18, %s1217_s18  }
   0xc   : > { %s1197_s25 = sadd.s32 4294967294, %s939_s23   ;;  %p60_p0 = scmp.ne.s32.totalorder %s923_s19, %s919_s18 }
   0xd   : > { %p61_p1 = scmp.eq.s32.totalorder %s1008_s24, 0  ;;  %p128_p2 = scmp.eq.s32.totalorder %s1008_s24, 1 }
   0xe   : > { %p134_p3 = scmp.eq.s32.totalorder %s1197_s25, 1  ;;  %p596_p5 = scmp.ge.s32.totalorder %s939_s23, 1 }
   0xf   : > { %p1019_p4 = por %p61_p1, %p60_p0  ;;  %p193_p7 = scmp.lt.s32.totalorder %s939_s23, 3 }
  0x10   : > { %p1024_p6 = por %p134_p3, %p60_p0  ;;  %s1207_s1 = sld [smem:[#allocation17_spill]] }
  0x11   : > { %p1032_p8 = pnand %p596_p5, %p193_p7  ;;  %s941_s7 = smov [#allocation5]  }
  0x12   : > { %s206_s8 = sshll.u32 %s941_s7, 4  ;;  %p598_p11 = scmp.ge.s32.totalorder %s939_s23, 2  ;;  %s207_s8 = int_to_ptr.vmem [resolvable:$true] %s206_s8 }
  0x13   : > { %p656_p9 = pneg %p1032_p8  ;;  %s1198_s9 = smov 64  }
  0x14   : > { %s1199_s10 = smov 4   ;;  %s38_s11 = sadd.s32 1, %s935_s22 }
  0x15   : > { %p657_p10 = pnand %p656_p9, %p61_p1  ;;  %p40_p12 = scmp.ge.s32.totalorder %s38_s11, 2 }
  0x16   : > { %s204_s30 = sshll.u32 %s1207_s1, 4  ;;  %s47_s12 = sadd.s32 1, %s927_s20  ;;  %s205_s30 = int_to_ptr.hbm [resolvable:$true] %s204_s30 }
  0x17   : > { %659 = dma.hbm_to_vmem [thread:$0]  (!%p657_p10), %s205_s30, 512, %s207_s8, [#allocation6], %s1198_s9, %s1198_s9, %s1199_s10  }
  0x18   : > { %p54_p13 = scmp.ne.s32.totalorder %s927_s20, %s923_s19  ;;  %p55_p0 = scmp.eq.s32.totalorder %s939_s23, 0 }
  0x19   : > { %s1223_s11 = smov (%p40_p12, %s38_s11), 0  ;;  %p675_p7 = scmp.lt.s32.totalorder %s939_s23, 2 }
  0x1a   : > { %1209 = sst [smem:[#allocation16_spill]] %s1223_s11  ;;  %p1051_p3 = por %p55_p0, %p54_p13 }
  0x1b   : > { %p1057_p5 = por %p128_p2, %p54_p13  ;;  %s42_s15 = ssub.s32 %s935_s22, %s1223_s11 }
  0x1c   : > { %p45_p9 = scmp.eq.s32.totalorder %s42_s15, 0  ;;  %s223_s16 = sand.u32 1, %s927_s20  }
  0x1d   : > { %s599_s17 = sshll.u32 %s223_s16, 3  ;;  %s632_s29 = sshll.u32 %s935_s22, 3 }
  0x1e   : > { %s1066_s28 = scalar_select %p45_p9, %s927_s20, %s47_s12  }
  0x1f   : > { %s234_s8 = scalar_lea.hbm %s1191_s0, %s632_s29  ;;  %s227_s25 = scalar_lea.vmem [#allocation2], %s599_s17 }
  0x20   : > { %s237_s9 = sshll.u32 %s227_s25, 4  ;;  %s235_s10 = sshll.u32 %s234_s8, 4  ;;  %s238_s9 = int_to_ptr.vmem [resolvable:$true] %s237_s9  ;;  %s236_s10 = int_to_ptr.hbm [resolvable:$true] %s235_s10 }
  0x21   : > { %p661_p2 = pnand %p675_p7, %p1051_p3  ;;  %s224_s1 = scalar_lea.sflag [#allocation3], %s223_s16 }
  0x22   : > { %s1212_s11 = smov 4   ;;  %s1213_s23 = smov 64  }
  0x23   : > { %663 = dma.hbm_to_vmem [thread:$0]  (!%p661_p2), %s236_s10, 128, %s238_s9, %s224_s1, %s1213_s23, %s1213_s23, %s1212_s11  }
  0x24   : > { %249 = sbr.rel (%p1032_p8) target bundleno = 230 (0xe6), region = 32  ;;  %s1080_s12 = sand.u32 (!%p1032_p8), 1, %s923_s19  }
  0x25   : > { %s603_s25 = sshll.u32 (!%p1032_p8), %s1080_s12, 3  ;;  %s252_s15 = scalar_lea.sflag (!%p1032_p8), [#allocation3], %s1080_s12 }
  0x26   : > { %s255_s17 = scalar_lea.vmem (!%p1032_p8), [#allocation2], %s603_s25 }
  0x29   : > { %902 = dma.done.wait (%p1019_p4), %s252_s15, 128  }
  0x2a   : > { %904 = vsyncadd (%p1019_p4), %s252_s15, 4294967168 }
  0x2b   : > { %906 = dma.done.wait (%p61_p1), [#allocation6], 512  }
  0x2c   : > { %908 = vsyncadd (%p61_p1), [#allocation6], 4294966784  ;;  %v637_v0 = vld [vmem:[#allocation5 + $0x18] sm:$0xff]  ;;  %v636_v1 = vld [vmem:[#allocation5 + $0x10] sm:$0xff]  ;;  %vm348_vm0 = vcmask 523264   ;;  %s1093_s1 = scalar_lea.vmem [#allocation8], %s1080_s12 }
  0x2d   : > { %356 = vmatpush.bf16.msra.mxu0 %v637_v0  ;;  %v635_v2 = vld [vmem:[#allocation5 + $0x8] sm:$0xff]  ;;  %v634_v3 = vld [vmem:[#allocation5] sm:$0xff]  ;;  %v633_v4 = vld [vmem:[%s255_s17] sm:$0xff]  ;;  %v944_v5 = vmov 0.0   ;;  %s1097_s23 = scalar_lea.vmem [#allocation10], %s1080_s12  ;;  %s638_s26 = sshll.u32 %s931_s21, 3 }
  0x2e   : > { %303 = vst [vmem:[%s1093_s1] sm:$0x1] %v944_v5  ;;  %v732_v7 = vld [vmem:[%s1193_s2] ss:$0 sm:$0xff]  ;;  %s414_s13 = scalar_lea.hbm %s1194_s3, %s638_s26  ;;  %s283_s16 = scalar_lea.vmem [#allocation7], %s603_s25 }
  0x2f   : > { %304 = vst [vmem:[%s1097_s23] sm:$0x1] %v944_v5  ;;  %s415_s29 = sshll.u32 %s283_s16, 4  ;;  %s417_s30 = sshll.u32 %s414_s13, 4  ;;  %s416_s29 = int_to_ptr.vmem [resolvable:$true] %s415_s29  ;;  %s418_s30 = int_to_ptr.hbm [resolvable:$true] %s417_s30 }
  0x30   : > { %s393_s7 = scalar_lea.sflag [#allocation4], %s1080_s12  ;;  %s807_s8 = sshra.s32 %s418_s30, 4  ;;  %s808_s8 = int_to_ptr.hbm [resolvable:$true] %s807_s8 }
  0x31   : > { %357 = vmatpush.bf16.msra.mxu0 %v636_v1  ;;  %s809_s15 = scalar_lea.hbm %s808_s8, 8  ;;  %s813_s26 = scalar_lea.hbm %s1194_s3, 16 }
  0x32   : > { %p810_p1 = scmp.ne.s32.totalorder %s808_s8, %s809_s15  ;;  %p814_p10 = scmp.lt.s32.totalorder %s808_s8, %s1194_s3 }
  0x33   : > { %p815_p12 = scmp.lt.s32.totalorder %s813_s26, %s809_s15 }
  0x34   : > { %p811_p4 = pnand %p810_p1, %p1057_p5 }
  0x35   : > { %358 = vmatpush.bf16.msra.mxu0 %v635_v2  ;;  %p816_p13 = por %p815_p12, %p814_p10 }
  0x36   : > { %p812_p8 = pneg %p811_p4 }
  0x38   : > { %p817_p0 = pnand %p816_p13, %p812_p8 }
  0x39   : > { %359 = vmatpush.bf16.msra.mxu0 %v634_v3 }
  0x3c   : > { %626 = vmatmul.msk.bf16.vlgmr.msra.gmra.mxu0 %vm348_vm0, %v633_v4 }
  0xb9   : > { %v361_v6 = vpop.f32.mrf.mxu0 }
  0xba   : > { %v362_v8 = vadd.f32 %v732_v7, %v361_v6 }
  0xbc   : > { %v381_v11 = vmul.f32 %v362_v8, %v362_v8 }
  0xc1   : > { %v363_v9 = vpop.f32.mrf.mxu0 }
  0xc2   : > { %v364_v10 = vadd.f32 %v732_v7, %v363_v9 }
  0xc4   : > { %v642_v12 = vpack.c.bf16 %v364_v10, %v362_v8  ;;  %v371_v13 = vadd.f32 %v364_v10, %v362_v8  ;;  %v382_v14 = vmul.f32 %v364_v10, %v364_v10 }
  0xc6   : > { %643 = vst [vmem:[%s283_s16] sm:$0xff] %v642_v12   ;;  %v372_v15 = vrot.slane %v371_v13, 4  ;;  %v383_v16 = vadd.f32 %v382_v14, %v381_v11 }
  0xc7   : > { %820 = shalt.err (!%p817_p0)
}
  0xc8   : > { %s945_s12 = smov 64   ;;  %s946_s10 = smov 4   ;;  %v373_v17 = vadd.f32 %v372_v15, %v371_v13  ;;  %v384_v18 = vrot.slane %v383_v16, 4  ;;  %v370_v25 = vld [vmem:[%s1093_s1] sm:$0x1] }
  0xc9   : > { %650 = dma.vmem_to_hbm [thread:$0]  (%p1057_p5), %s416_s29, 128, %s418_s30, %s393_s7, %s945_s12, %s945_s12, %s946_s10  }
  0xca   : > { %v374_v19 = vrot.slane %v373_v17, 2  ;;  %v385_v20 = vadd.f32 %v384_v18, %v383_v16  ;;  %s429_s16 = scalar_lea.hbm %s1195_s4, %s931_s21  ;;  %s397_s8 = sand.u32 1, %s1008_s24   ;;  %v380_v28 = vld [vmem:[%s1097_s23] sm:$0x1] }
  0xcb   : > { %s442_s29 = scalar_lea.hbm %s1196_s5, %s931_s21  ;;  %s431_s30 = sshll.u32 %s1093_s1, 4  ;;  %s432_s30 = int_to_ptr.vmem [resolvable:$true] %s431_s30 }
  0xcc   : > { %v375_v21 = vadd.f32 %v374_v19, %v373_v17  ;;  %v386_v22 = vrot.slane %v385_v20, 2  ;;  %s1129_s7 = sshll.u32 %s429_s16, 4  ;;  %s444_s17 = sshll.u32 %s1097_s23, 4  ;;  %s434_s7 = int_to_ptr.hbm [resolvable:$true] %s1129_s7  ;;  %s1137_s17 = int_to_ptr.vmem [resolvable:$true] %s444_s17 }
  0xcd   : > { %s1133_s26 = sshll.u32 %s442_s29, 4  ;;  %s398_s21 = scalar_lea.sflag [#allocation9], %s397_s8  ;;  %s447_s26 = int_to_ptr.hbm [resolvable:$true] %s1133_s26 }
  0xce   : > { %v376_v23 = vrot.slane %v375_v21, 1  ;;  %v387_v24 = vadd.f32 %v386_v22, %v385_v20  ;;  %s835_s24 = sshra.s32 %s434_s7, 4  ;;  %s841_s10 = scalar_lea.hbm %s1195_s4, 2  ;;  %s836_s24 = int_to_ptr.hbm [resolvable:$true] %s835_s24 }
  0xcf   : > { %s837_s6 = scalar_lea.hbm %s836_s24, 1  ;;  %p842_p2 = scmp.lt.s32.totalorder %s836_s24, %s1195_s4 }
  0xd0   : > { %v377_v26 = vadd.f32 %v376_v23, %v375_v21  ;;  %v388_v27 = vrot.slane %v387_v24, 1  ;;  %p838_p3 = scmp.ne.s32.totalorder %s836_s24, %s837_s6  ;;  %p843_p1 = scmp.lt.s32.totalorder %s841_s10, %s837_s6 }
  0xd2   : > { %v389_v29 = vadd.f32 %v388_v27, %v387_v24  ;;  %v378_v30 = vadd.f32 %v377_v26, %v370_v25  ;;  %p839_p7 = pnand %p838_p3, %p1057_p5  ;;  %p844_p4 = por %p843_p1, %p842_p2 }
  0xd4   : > { %379 = vst [vmem:[%s1093_s1] sm:$0x1] %v378_v30  ;;  %v390_v31 = vadd.f32 %v389_v29, %v380_v28  ;;  %p840_p9 = pneg %p839_p7 }
  0xd6   : > { %p845_p8 = pnand %p844_p4, %p840_p9 }
  0xd8   : > { %848 = shalt.err (!%p845_p8)
}
  0xd9   : > { %651 = dma.vmem_to_hbm [thread:$0]  (%p1057_p5), %s432_s30, 16, %s434_s7, %s398_s21   ;;  %391 = vst [vmem:[%s1097_s23] sm:$0x1] %v390_v31 }
  0xda   : > { %s863_s1 = sshra.s32 %s447_s26, 4  ;;  %s869_s25 = scalar_lea.hbm %s1196_s5, 2  ;;  %s864_s1 = int_to_ptr.hbm [resolvable:$true] %s863_s1 }
  0xdb   : > { %s865_s16 = scalar_lea.hbm %s864_s1, 1  ;;  %p870_p0 = scmp.lt.s32.totalorder %s864_s1, %s1196_s5 }
  0xdc   : > { %p866_p10 = scmp.ne.s32.totalorder %s864_s1, %s865_s16  ;;  %p871_p3 = scmp.lt.s32.totalorder %s869_s25, %s865_s16 }
  0xde   : > { %p867_p12 = pnand %p866_p10, %p1057_p5  ;;  %p872_p7 = por %p871_p3, %p870_p0 }
  0xe0   : > { %p868_p13 = pneg %p867_p12 }
  0xe2   : > { %p873_p9 = pnand %p872_p7, %p868_p13 }
  0xe4   : > { %876 = shalt.err (!%p873_p9)
}
  0xe5   : > { %652 = dma.vmem_to_hbm [thread:$0]  (%p1057_p5), %s1137_s17, 16, %s447_s26, %s398_s21  }
  0xe6 PF: > { %s1214_s23 = sld [smem:[#allocation15_spill]]  ;;  %s458_s30 = sand.u32 1, %s919_s18  }
  0xe7   : > { %p665_p2 = pnand %p598_p11, %p1024_p6  ;;  %s459_s7 = scalar_lea.sflag [#allocation4], %s458_s30 }
  0xe9   : > { %p666_p1 = pneg %p665_p2 }
  0xeb   : > { %910 = dma.done.wait (%p666_p1), %s459_s7, 128  }
  0xec   : > { %912 = vsyncadd (%p666_p1), %s459_s7, 4294967168  ;;  %s1215_s6 = sadd.s32 4294967294, %s1214_s23  }
  0xed   : > { %s468_s9 = sand.u32 1, %s1215_s6  }
  0xee   : > { %s469_s14 = scalar_lea.sflag [#allocation9], %s468_s9 }
  0xef   : > { %914 = dma.done.wait (%p666_p1), %s469_s14, 32  }
  0xf0   : > { %916 = vsyncadd (%p666_p1), %s469_s14, 4294967264  ;;  %s26_s23 = sadd.s32 1, %s1214_s23   ;;  %s1216_s27 = sld [smem:[#allocation16_spill]] }
  0xf1   : > { %p23_p5 = scmp.ge.s32.totalorder %s26_s23, 4   ;;  %s1217_s18 = smov %s923_s19 }
  0xf2   : > { %s1218_s19 = smov %s927_s20  ;;  %s1219_s20 = smov %s1066_s28 }
  0xf3   : > { %s1220_s21 = smov %s935_s22  ;;  %25 = sbr.rel (!%p23_p5) target bundleno = 11 (0xb), region = 117 }
  0xf6   : > { %s1221_s22 = smov %s1216_s27 }
  0xf8   :  { %483 = vsyncpa [#allocation3], 1 }
  0xf9   :  { %485 = vsyncpa [#allocation3 + $0x1], 1 }
  0xfa   :  { %486 = vsyncpa [#allocation6], 1 }
  0xfb   :  { %487 = vsyncpa [#allocation4], 1 }
  0xfc   :  { %489 = vsyncpa [#allocation4 + $0x1], 1 }
  0xfd   :  { %490 = vsyncpa [#allocation9], 1 }
  0xfe   :  { %492 = vsyncpa [#allocation9 + $0x1], 1 }

</bundles_post_ra>
